<compile_context>
chip_gen: v6e
topology: v6e:2x2x1
jax: 0.10.0
libtpu: 0.0.40
codegen_flags: <defaults>
</compile_context>

<pallas_src>
import math

import jax
import jax.numpy as jnp
from jax.experimental import pallas as pl
from jax.experimental.pallas import tpu as pltpu


# --------------------------------------------------------------------------
# Pallas kernel
# --------------------------------------------------------------------------

def _linear_kernel(x_ref, w_ref, b_ref, o_ref):
    # x_ref: (TILE, FEAT)  w_ref: (FEAT, OUT_COLS)  b_ref: (1, OUT_COLS)
    # o_ref: (TILE, OUT_COLS)
    y = jnp.dot(x_ref[...], w_ref[...], preferred_element_type=jnp.float32)
    y = y + b_ref[...]
    o_ref[...] = y.astype(o_ref.dtype)


def _round_up(x, m):
    return ((x + m - 1) // m) * m


def _round_down(x, m):
    return (x // m) * m


# --------------------------------------------------------------------------
# Wrapper
# --------------------------------------------------------------------------

def reduce_fourier_dim_linear(x, w, b, *,
                              target_tile_bytes=2 << 20,
                              vmem_budget_bytes=18 << 20,
                              max_pack=16):
    """y[b,p,c,:] = x[b,p,c,:] @ w + b   (w: (F, out_dim), b: (out_dim,))."""
    B, P, C, Fdim = x.shape
    out_dim = w.shape[1]
    rows = B * P * C

    in_itemsize = jnp.dtype(x.dtype).itemsize
    out_itemsize = in_itemsize
    # sublane multiple for the row-tile (8 for f32, 16 for bf16, 32 for int8)
    sub = {4: 8, 2: 16, 1: 32}.get(in_itemsize, 8)

    # ---- output lane-packing factor -------------------------------------
    k = 128 // math.gcd(out_dim, 128)
    w_pack_bytes = (k * Fdim) * (k * out_dim) * in_itemsize
    use_pack = (k > 1 and k <= max_pack and rows % k == 0
                and w_pack_bytes <= (8 << 20))
    if not use_pack:
        k = 1

    rows_g = rows // k
    feat = k * Fdim
    out_cols = k * out_dim

    x_g = x.reshape(rows_g, feat)                 # free (row-major, no copy)
    if k > 1:
        # Block-diagonal weight: (rows/k, k*F) @ (k*F, k*out) == per-row linear.
        w_g = jnp.kron(jnp.eye(k, dtype=w.dtype), w)
        b_g = jnp.tile(b, k).reshape(1, out_cols)
    else:
        w_g = w
        b_g = b.reshape(1, out_cols)

    # ---- row tile sizing --------------------------------------------------
    def _vmem_est(t):
        return (2 * t * feat * in_itemsize            # x  (double-buffered)
                + 2 * t * out_cols * out_itemsize     # out (double-buffered)
                + 2 * feat * out_cols * in_itemsize   # weight (2 buffers)
                + 2 * out_cols * in_itemsize)         # bias

    if rows_g <= sub:
        tile = rows_g                                  # single full-extent block
    else:
        tile = target_tile_bytes // max(1, feat * in_itemsize)
        tile = max(sub, min(tile, 2048))
        # Guarantee >=2 grid steps when rows allow (v7x: 2 TensorCores).
        half = _round_up(-(-rows_g // 2), sub)
        tile = min(tile, half)
        tile = max(sub, _round_down(tile, sub))
        # Shrink until the VMEM estimate fits the budget (v5e/v7x headroom).
        while _vmem_est(tile) > vmem_budget_bytes and tile > sub:
            tile = max(sub, _round_down(tile // 2, sub))

    est = _vmem_est(tile)
    vmem_limit = int(min(32 << 20, max(16 << 20, est + (4 << 20))))

    grid = (pl.cdiv(rows_g, tile),)                   # ragged last block masked

    y = pl.pallas_call(
        _linear_kernel,
        out_shape=jax.ShapeDtypeStruct((rows_g, out_cols), x.dtype),
        grid_spec=pltpu.PrefetchScalarGridSpec(
            num_scalar_prefetch=0,
            grid=grid,
            in_specs=[
                pl.BlockSpec((tile, feat), lambda i: (i, 0)),
                pl.BlockSpec((feat, out_cols), lambda i: (0, 0)),
                pl.BlockSpec((1, out_cols), lambda i: (0, 0)),
            ],
            out_specs=pl.BlockSpec((tile, out_cols), lambda i: (i, 0)),
        ),
        compiler_params=pltpu.CompilerParams(
            dimension_semantics=("parallel",),
            vmem_limit_bytes=vmem_limit,
        ),
    )(x_g, w_g, b_g)

    # Free reshape back: (rows_g, k*out_dim) has exactly the row-major bytes of
    # (B, P, C, out_dim).
    return y.reshape(B, P, C, out_dim)


# --------------------------------------------------------------------------
# Parameter init (matches PyTorch nn.Linear defaults) + forward wrapper
# --------------------------------------------------------------------------

def init_reduce_fourier_dim_linear_params(key, input_dim, output_dim):
    kw, kb = jax.random.split(key)
    bound = 1.0 / math.sqrt(input_dim)
    # Stored as (input_dim, output_dim) so the kernel does x @ w directly
    # (equivalent to PyTorch's x @ W.T with W of shape (out, in)).
    w = jax.random.uniform(kw, (input_dim, output_dim), jnp.float32, -bound, bound)
    b = jax.random.uniform(kb, (output_dim,), jnp.float32, -bound, bound)
    return {"w": w, "b": b}


@jax.jit
def reduce_fourier_dim_linear_forward(x, params):
    return reduce_fourier_dim_linear(x, params["w"], params["b"])


# --------------------------------------------------------------------------
# Demo
# --------------------------------------------------------------------------

if __name__ == "__main__":
    key = jax.random.PRNGKey(0)
    kx, kp = jax.random.split(key)

    B, P, C, F_dim = 2, 8, 4, 32     # (batch, patches, channels, fourier dim)
    output_dim = 16

    x = jax.random.normal(kx, (B, P, C, F_dim), jnp.float32)
    params = init_reduce_fourier_dim_linear_params(kp, F_dim, output_dim)

    # Lane-packed path (rows = 64 divisible by k = 8).
    y = reduce_fourier_dim_linear_forward(x, params)
    jax.block_until_ready(y)
    assert y.shape == (B, P, C, output_dim)

    y_ref = (x.reshape(B * P * C, F_dim) @ params["w"] + params["b"]
             ).reshape(B, P, C, output_dim)
    assert bool(jnp.all(jnp.isfinite(y)))
    assert bool(jnp.allclose(y, y_ref, atol=1e-5, rtol=1e-5)), "mismatch vs reference"

    # Fallback path (rows = 15, not divisible by k): ragged grid + masked store.
    x2 = jax.random.normal(kx, (1, 3, 5, F_dim), jnp.float32)
    y2 = reduce_fourier_dim_linear_forward(x2, params)
    jax.block_until_ready(y2)
    y2_ref = (x2.reshape(15, F_dim) @ params["w"] + params["b"]
              ).reshape(1, 3, 5, output_dim)
    assert bool(jnp.allclose(y2, y2_ref, atol=1e-5, rtol=1e-5)), "mismatch (fallback path)"

    print("KERNEL_OK")
</pallas_src>

<mosaic_0001>
module attributes {stable_mosaic.version = 11 : i64} {
  func.func @_linear_kernel(%arg0: i32, %arg1: memref<8x256xf32, #tpu.memory_space<vmem>>, %arg2: memref<256x128xf32, #tpu.memory_space<vmem>>, %arg3: memref<1x128xf32, #tpu.memory_space<vmem>>, %arg4: memref<8x128xf32, #tpu.memory_space<vmem>>) attributes {dimension_semantics = [#tpu.dimension_semantics<parallel>], iteration_bounds = array<i64: 1>, scalar_prefetch = 0 : i64, scratch_operands = 0 : i64, tpu.core_type = #tpu.core_type<tc>, window_params = [{transform_indices = @transform_0, window_bounds = array<i64: 8, 256>}, {pipeline_mode = #tpu.pipeline_mode<synchronous>, transform_indices = @transform_1, window_bounds = array<i64: 256, 128>}, {pipeline_mode = #tpu.pipeline_mode<synchronous>, transform_indices = @transform_2, window_bounds = array<i64: 1, 128>}, {transform_indices = @transform_3, window_bounds = array<i64: 8, 128>}]} {
    %c0 = arith.constant 0 : index
    %c0_0 = arith.constant 0 : index
    %0 = vector.load %arg1[%c0, %c0_0] : memref<8x256xf32, #tpu.memory_space<vmem>>, vector<8x256xf32>
    %c0_1 = arith.constant 0 : index
    %c0_2 = arith.constant 0 : index
    %1 = vector.load %arg2[%c0_1, %c0_2] : memref<256x128xf32, #tpu.memory_space<vmem>>, vector<256x128xf32>
    %cst = arith.constant dense<0.000000e+00> : vector<8x128xf32>
    %2 = tpu.matmul %0, %1, %cst {dimension_numbers = #tpu.dot_dimension_numbers<[1], [0], [0], [1], [0, 0, 1, 1], [], []>} : vector<8x256xf32>, vector<256x128xf32>, vector<8x128xf32> -> vector<8x128xf32>
    %c0_3 = arith.constant 0 : index
    %c0_4 = arith.constant 0 : index
    %3 = vector.load %arg3[%c0_3, %c0_4] : memref<1x128xf32, #tpu.memory_space<vmem>>, vector<1x128xf32>
    %4 = vector.broadcast %3 : vector<1x128xf32> to vector<8x128xf32>
    %5 = arith.addf %2, %4 : vector<8x128xf32>
    %c0_5 = arith.constant 0 : index
    %c0_6 = arith.constant 0 : index
    %6 = vector.load %arg4[%c0_5, %c0_6] : memref<8x128xf32, #tpu.memory_space<vmem>>, vector<8x128xf32>
    tpu.vector_store %arg4[%c0_5, %c0_6], %5 {strides = array<i32>} : memref<8x128xf32, #tpu.memory_space<vmem>>, vector<8x128xf32>,
    return
  }
  func.func @transform_0(%arg0: i32) -> (i32, i32) {
    %c0_i32 = arith.constant 0 : i32
    %c0_i32_0 = arith.constant 0 : i32
    return %arg0, %c0_i32 : i32, i32
  }
  func.func @transform_1(%arg0: i32) -> (i32, i32) {
    %c0_i32 = arith.constant 0 : i32
    %c0_i32_0 = arith.constant 0 : i32
    %c0_i32_1 = arith.constant 0 : i32
    return %c0_i32, %c0_i32_0 : i32, i32
  }
  func.func @transform_2(%arg0: i32) -> (i32, i32) {
    %c0_i32 = arith.constant 0 : i32
    %c0_i32_0 = arith.constant 0 : i32
    %c0_i32_1 = arith.constant 0 : i32
    return %c0_i32, %c0_i32_0 : i32, i32
  }
  func.func @transform_3(%arg0: i32) -> (i32, i32) {
    %c0_i32 = arith.constant 0 : i32
    %c0_i32_0 = arith.constant 0 : i32
    return %arg0, %c0_i32 : i32, i32
  }
}

</mosaic_0001>

<bundles_post_ra>
// kernel: tile.8
= control target key start
LH: loop header
LB: loop body
LE: loop exit
PB: predicated region body
PF: predicated region fallthrough
CT: control target
= control target key end

     0   :  { %s22_s0 = inlined_call_operand.vmem [shape: f32[16], index: 0, kind: input, shape index: {}]   ;;  %s23_s1 = inlined_call_operand.vmem [shape: f32[8,16], index: 1, kind: output, shape index: {}]  }
   0x1   :  { %v4_v0 = vld [vmem:[%s22_s0] ss:$0 sm:$0xff] }
   0x2   :  { %5 = vst [vmem:[%s23_s1] sm:$0xff] %v4_v0 }

// kernel: tile.9
= control target key start
LH: loop header
LB: loop body
LE: loop exit
PB: predicated region body
PF: predicated region fallthrough
CT: control target
= control target key end

     0   :  { %s69_s10 = smov 112   ;;  %s70_s11 = smov 80   ;;  %vm3_vm0 = vcmask 130048   ;;  %vm9_vm1 = vcmask 1048448   ;;  %vm15_vm2 = vcmask 917248   ;;  %vm21_vm3 = vcmask 786048   ;;  %s113_s0 = inlined_call_operand.vmem [shape: f32[8,16], index: 0, kind: input, shape index: {}]   ;;  %s114_s1 = inlined_call_operand.vmem [shape: f32[1,128], index: 1, kind: output, shape index: {}]  }
   0x1   :  { %v55_v0 = vld [vmem:[%s113_s0 + $0x7] sm:$0x1]   ;;  %v57_v1 = vld [vmem:[%s113_s0 + $0x5] sm:$0x1]   ;;  %v56_v2 = vld [vmem:[%s113_s0 + $0x6] sm:$0x1]  }
   0x2   :  { %7 = vrot.lane.b32.xlu0 %v55_v0, %s69_s10  ;;  %19 = vrot.lane.b32.xlu1 %v57_v1, %s70_s11  ;;  %v58_v3 = vld [vmem:[%s113_s0 + $0x4] sm:$0x1]   ;;  %v2_v4 = vld [vmem:[%s113_s0] sm:$0x1]   ;;  %s71_s18 = smov 96   ;;  %s72_s19 = smov 64  }
   0x3   :  { %4 = vst.msk [vmem:[#allocation0] sm:$0x1] %vm3_vm0, %v2_v4   ;;  %v59_v5 = vld [vmem:[%s113_s0 + $0x3] sm:$0x1]   ;;  %v60_v6 = vld [vmem:[%s113_s0 + $0x2] sm:$0x1]  }
   0x4   :  { %s73_s24 = smov 48   ;;  %s74_s25 = smov 32   ;;  %v61_v7 = vld [vmem:[%s113_s0 + $0x1] sm:$0x1]   ;;  %vm27_vm4 = vcmask 654848   ;;  %vm33_vm5 = vcmask 523648  }
   0x5   :  { %s75_s0 = smov 16   ;;  %vm39_vm6 = vcmask 392448   ;;  %vm45_vm7 = vcmask 261248  }
   0x6   :  { %13 = vrot.lane.b32.xlu0 %v56_v2, %s71_s18  ;;  %25 = vrot.lane.b32.xlu1 %v58_v3, %s72_s19 }
   0xa   :  { %31 = vrot.lane.b32.xlu0 %v59_v5, %s73_s24  ;;  %37 = vrot.lane.b32.xlu1 %v60_v6, %s74_s25 }
   0xe   :  { %43 = vrot.lane.b32.xlu0 %v61_v7, %s75_s0 }
  0x74   :  { %v8_v8 = vpop.permute.xlu0 %7   ;;  %v20_v9 = vpop.permute.xlu1 %19  }
  0x75   :  { %10 = vst.msk [vmem:[#allocation0] sm:$0x1] %vm9_vm1, %v8_v8  }
  0x78   :  { %v14_v10 = vpop.permute.xlu0 %13   ;;  %v26_v11 = vpop.permute.xlu1 %25  }
  0x79   :  { %16 = vst.msk [vmem:[#allocation0] sm:$0x1] %vm15_vm2, %v14_v10  }
  0x7a   :  { %22 = vst.msk [vmem:[#allocation0] sm:$0x1] %vm21_vm3, %v20_v9  }
  0x7b   :  { %28 = vst.msk [vmem:[#allocation0] sm:$0x1] %vm27_vm4, %v26_v11  }
  0x7c   :  { %v32_v12 = vpop.permute.xlu0 %31   ;;  %v38_v13 = vpop.permute.xlu1 %37  }
  0x7d   :  { %34 = vst.msk [vmem:[#allocation0] sm:$0x1] %vm33_vm5, %v32_v12  }
  0x7e   :  { %40 = vst.msk [vmem:[#allocation0] sm:$0x1] %vm39_vm6, %v38_v13  }
  0x80   :  { %v44_v14 = vpop.permute.xlu0 %43  }
  0x81   :  { %46 = vst.msk [vmem:[#allocation0] sm:$0x1] %vm45_vm7, %v44_v14  }
  0x88   :  { %v51_v15 = vld [vmem:[#allocation0] sm:$0x1] }
  0x89   :  { %54 = vst [vmem:[%s114_s1] sm:$0x1] %v51_v15 }

</bundles_post_ra>
